<compile_context>
chip_gen: v7x
topology: tpu7x:2x2x1
jax: 0.10.0
libtpu: 0.0.40
codegen_flags: <defaults>
</compile_context>

<pallas_src>
import jax
import jax.numpy as jnp
from jax.experimental import pallas as pl
from jax.experimental.pallas import tpu as pltpu

EPS = 1e-5


# --------------------------------------------------------------------------
# Monolithic kernel (whole batch in one block) — used for small N.
# --------------------------------------------------------------------------
def _mono_kernel(x_ref, w1_ref, bn1_ref, w2_ref, bn2_ref, o_ref):
    # fc1 on the MXU: bf16 inputs, f32 accumulation.
    h = jnp.dot(x_ref[...], w1_ref[...], preferred_element_type=jnp.float32)

    # BatchNorm1d(256), training semantics (batch stats, biased variance),
    # folded into a fused scale/shift.
    bn1 = bn1_ref[...]                       # (2, H1): row 0 = gamma, row 1 = beta
    mean1 = jnp.mean(h, axis=0, keepdims=True)
    d1 = h - mean1
    var1 = jnp.mean(d1 * d1, axis=0, keepdims=True)
    scale1 = bn1[0:1, :] * jax.lax.rsqrt(var1 + EPS)
    shift1 = bn1[1:2, :] - mean1 * scale1
    a = jnp.maximum(h * scale1 + shift1, 0.0)          # ReLU

    # fc2 on the MXU.
    y = jnp.dot(a.astype(jnp.bfloat16), w2_ref[...],
                preferred_element_type=jnp.float32)

    # BatchNorm1d(128) + ReLU.
    bn2 = bn2_ref[...]
    mean2 = jnp.mean(y, axis=0, keepdims=True)
    d2 = y - mean2
    var2 = jnp.mean(d2 * d2, axis=0, keepdims=True)
    scale2 = bn2[0:1, :] * jax.lax.rsqrt(var2 + EPS)
    shift2 = bn2[1:2, :] - mean2 * scale2
    o_ref[...] = jnp.maximum(y * scale2 + shift2, 0.0)


def _run_mono(xb, w1b, bn1, w2b, bn2):
    n, c_in = xb.shape
    h1 = w1b.shape[1]
    h2 = w2b.shape[1]
    return pl.pallas_call(
        _mono_kernel,
        out_shape=jax.ShapeDtypeStruct((n, h2), jnp.float32),
        grid=(1,),
        in_specs=[
            pl.BlockSpec((n, c_in), lambda i: (0, 0)),
            pl.BlockSpec((c_in, h1), lambda i: (0, 0)),
            pl.BlockSpec((2, h1), lambda i: (0, 0)),
            pl.BlockSpec((h1, h2), lambda i: (0, 0)),
            pl.BlockSpec((2, h2), lambda i: (0, 0)),
        ],
        out_specs=pl.BlockSpec((n, h2), lambda i: (0, 0)),
        compiler_params=pltpu.CompilerParams(
            dimension_semantics=("arbitrary",)),
    )(xb, w1b, bn1, w2b, bn2)


# --------------------------------------------------------------------------
# Tiled path — three passes, two-pass BatchNorm with full-batch statistics.
# --------------------------------------------------------------------------
def _fc1_stats_kernel(x_ref, w1_ref, h_ref, stats_ref):
    """Pass A: h = x @ w1 (per row-tile) + accumulate column sum / sumsq."""
    j = pl.program_id(0)
    h = jnp.dot(x_ref[...], w1_ref[...], preferred_element_type=jnp.float32)
    h_ref[...] = h

    @pl.when(j == 0)
    def _():
        stats_ref[...] = jnp.zeros_like(stats_ref)

    # Zero-padded rows contribute exactly 0 to both sums.
    s = jnp.sum(h, axis=0, keepdims=True)
    sq = jnp.sum(h * h, axis=0, keepdims=True)
    stats_ref[...] += jnp.concatenate([s, sq], axis=0)


def _make_bn1_fc2_kernel(n_true, block_rows):
    inv_n = 1.0 / float(n_true)

    def kernel(h_ref, stats1_ref, bn1_ref, w2_ref, y_ref, stats2_ref):
        """Pass B: BN1 (from accumulated stats) + ReLU + fc2 + BN2 stats."""
        j = pl.program_id(0)
        h = h_ref[...]                               # (Tm, H1) f32
        stats1 = stats1_ref[...]
        bn1 = bn1_ref[...]

        mean1 = stats1[0:1, :] * inv_n
        var1 = jnp.maximum(stats1[1:2, :] * inv_n - mean1 * mean1, 0.0)
        scale1 = bn1[0:1, :] * jax.lax.rsqrt(var1 + EPS)
        shift1 = bn1[1:2, :] - mean1 * scale1
        a = jnp.maximum(h * scale1 + shift1, 0.0)

        # Mask out zero-padded rows so they do not pollute BN2 statistics.
        row = jax.lax.broadcasted_iota(jnp.int32, a.shape, 0) + j * block_rows
        a = jnp.where(row < n_true, a, 0.0)

        y = jnp.dot(a.astype(jnp.bfloat16), w2_ref[...],
                    preferred_element_type=jnp.float32)
        y_ref[...] = y

        @pl.when(j == 0)
        def _():
            stats2_ref[...] = jnp.zeros_like(stats2_ref)

        s = jnp.sum(y, axis=0, keepdims=True)
        sq = jnp.sum(y * y, axis=0, keepdims=True)
        stats2_ref[...] += jnp.concatenate([s, sq], axis=0)

    return kernel


def _make_bn2_kernel(n_true):
    inv_n = 1.0 / float(n_true)

    def kernel(y_ref, stats2_ref, bn2_ref, o_ref):
        """Pass C: BN2 (from accumulated stats) + ReLU."""
        y = y_ref[...]
        stats2 = stats2_ref[...]
        bn2 = bn2_ref[...]
        mean2 = stats2[0:1, :] * inv_n
        var2 = jnp.maximum(stats2[1:2, :] * inv_n - mean2 * mean2, 0.0)
        scale2 = bn2[0:1, :] * jax.lax.rsqrt(var2 + EPS)
        shift2 = bn2[1:2, :] - mean2 * scale2
        o_ref[...] = jnp.maximum(y * scale2 + shift2, 0.0)

    return kernel


def _run_tiled(xb, w1b, bn1, w2b, bn2, n_true, block_rows):
    n_pad, c_in = xb.shape
    h1 = w1b.shape[1]
    h2 = w2b.shape[1]
    num_tiles = n_pad // block_rows

    # Pass A: fc1 per tile + full-batch BN1 statistics accumulation.
    h, stats1 = pl.pallas_call(
        _fc1_stats_kernel,
        out_shape=(jax.ShapeDtypeStruct((n_pad, h1), jnp.float32),
                   jax.ShapeDtypeStruct((2, h1), jnp.float32)),
        grid=(num_tiles,),
        in_specs=[
            pl.BlockSpec((block_rows, c_in), lambda j: (j, 0)),
            pl.BlockSpec((c_in, h1), lambda j: (0, 0)),
        ],
        out_specs=(pl.BlockSpec((block_rows, h1), lambda j: (j, 0)),
                   pl.BlockSpec((2, h1), lambda j: (0, 0))),
        compiler_params=pltpu.CompilerParams(
            dimension_semantics=("arbitrary",)),
    )(xb, w1b)

    # Pass B: BN1 + ReLU + fc2 per tile + full-batch BN2 stats accumulation.
    y, stats2 = pl.pallas_call(
        _make_bn1_fc2_kernel(n_true, block_rows),
        out_shape=(jax.ShapeDtypeStruct((n_pad, h2), jnp.float32),
                   jax.ShapeDtypeStruct((2, h2), jnp.float32)),
        grid=(num_tiles,),
        in_specs=[
            pl.BlockSpec((block_rows, h1), lambda j: (j, 0)),
            pl.BlockSpec((2, h1), lambda j: (0, 0)),
            pl.BlockSpec((2, h1), lambda j: (0, 0)),
            pl.BlockSpec((h1, h2), lambda j: (0, 0)),
        ],
        out_specs=(pl.BlockSpec((block_rows, h2), lambda j: (j, 0)),
                   pl.BlockSpec((2, h2), lambda j: (0, 0))),
        compiler_params=pltpu.CompilerParams(
            dimension_semantics=("arbitrary",)),
    )(h, stats1, bn1, w2b)

    # Pass C: BN2 + ReLU per tile (embarrassingly parallel over row tiles).
    out = pl.pallas_call(
        _make_bn2_kernel(n_true),
        out_shape=jax.ShapeDtypeStruct((n_pad, h2), jnp.float32),
        grid=(num_tiles,),
        in_specs=[
            pl.BlockSpec((block_rows, h2), lambda j: (j, 0)),
            pl.BlockSpec((2, h2), lambda j: (0, 0)),
            pl.BlockSpec((2, h2), lambda j: (0, 0)),
        ],
        out_specs=pl.BlockSpec((block_rows, h2), lambda j: (j, 0)),
        compiler_params=pltpu.CompilerParams(
            dimension_semantics=("parallel",)),
    )(y, stats2, bn2)

    return out[:n_true]


# --------------------------------------------------------------------------
# Public wrapper.
# --------------------------------------------------------------------------
def embedding_layer(x, w1, g1, b1, w2, g2, b2, *,
                    block_rows=256, mono_max_rows=1024):
    """x: (N, C_in) f32 -> (N, 128) f32.

    Weights are stored (C_in, C_out) so y = x @ W (== PyTorch x @ weight.T).
    Matmul operands are cast to bf16 (f32 accumulation); BN math is f32.
    """
    n, c_in = x.shape
    h1 = w1.shape[1]
    h2 = w2.shape[1]

    # bf16 operands for the MXU (halves weight/activation HBM traffic).
    xb = x.astype(jnp.bfloat16)
    w1b = w1.astype(jnp.bfloat16)
    w2b = w2.astype(jnp.bfloat16)

    # Pack BN affine params: row 0 = gamma, row 1 = beta (one DMA each layer).
    bn1 = jnp.concatenate(
        [g1.reshape(1, h1), b1.reshape(1, h1)], axis=0).astype(jnp.float32)
    bn2 = jnp.concatenate(
        [g2.reshape(1, h2), b2.reshape(1, h2)], axis=0).astype(jnp.float32)

    if n <= mono_max_rows:
        return _run_mono(xb, w1b, bn1, w2b, bn2)

    # Tiled path: pad N up to a multiple of block_rows with zero rows (zero
    # rows contribute nothing to BN1 stats; they are masked before fc2).
    n_pad = ((n + block_rows - 1) // block_rows) * block_rows
    if n_pad != n:
        xb = jnp.pad(xb, ((0, n_pad - n), (0, 0)))
    return _run_tiled(xb, w1b, bn1, w2b, bn2, n, block_rows)


# --------------------------------------------------------------------------
# Pure-JAX references.
# --------------------------------------------------------------------------
def reference_f32(x, w1, g1, b1, w2, g2, b2):
    """Full-f32 PyTorch training-mode forward."""
    h = x @ w1
    m = h.mean(0, keepdims=True)
    v = ((h - m) ** 2).mean(0, keepdims=True)
    a = jnp.maximum((h - m) / jnp.sqrt(v + EPS) * g1 + b1, 0.0)
    y = a @ w2
    m2 = y.mean(0, keepdims=True)
    v2 = ((y - m2) ** 2).mean(0, keepdims=True)
    return jnp.maximum((y - m2) / jnp.sqrt(v2 + EPS) * g2 + b2, 0.0)


def reference_mixed(x, w1, g1, b1, w2, g2, b2):
    """Same mixed precision as the kernel: bf16 matmul inputs, f32 BN math."""
    h = jnp.dot(x.astype(jnp.bfloat16), w1.astype(jnp.bfloat16),
                preferred_element_type=jnp.float32)
    m = h.mean(0, keepdims=True)
    v = ((h - m) ** 2).mean(0, keepdims=True)
    a = jnp.maximum((h - m) * jax.lax.rsqrt(v + EPS) * g1 + b1, 0.0)
    y = jnp.dot(a.astype(jnp.bfloat16), w2.astype(jnp.bfloat16),
                preferred_element_type=jnp.float32)
    m2 = y.mean(0, keepdims=True)
    v2 = ((y - m2) ** 2).mean(0, keepdims=True)
    return jnp.maximum((y - m2) * jax.lax.rsqrt(v2 + EPS) * g2 + b2, 0.0)


if __name__ == "__main__":
    # Small shapes consistent with the module (in_channel=512 default).
    N, C_IN, H1, H2 = 8, 512, 256, 128

    key = jax.random.PRNGKey(0)
    kx, kw1, kw2, kg1, kb1, kg2, kb2, kx2 = jax.random.split(key, 8)

    x = jax.random.normal(kx, (N, C_IN), dtype=jnp.float32)
    w1 = jax.random.normal(kw1, (C_IN, H1), dtype=jnp.float32) * (1.0 / jnp.sqrt(C_IN))
    w2 = jax.random.normal(kw2, (H1, H2), dtype=jnp.float32) * (1.0 / jnp.sqrt(H1))
    g1 = 1.0 + 0.1 * jax.random.normal(kg1, (H1,), dtype=jnp.float32)
    b1 = 0.1 * jax.random.normal(kb1, (H1,), dtype=jnp.float32)
    g2 = 1.0 + 0.1 * jax.random.normal(kg2, (H2,), dtype=jnp.float32)
    b2 = 0.1 * jax.random.normal(kb2, (H2,), dtype=jnp.float32)

    # --- small-batch (monolithic) path ---
    out = jax.block_until_ready(embedding_layer(x, w1, g1, b1, w2, g2, b2))
    assert out.shape == (N, H2), out.shape
    ref_m = reference_mixed(x, w1, g1, b1, w2, g2, b2)
    ref_f = reference_f32(x, w1, g1, b1, w2, g2, b2)
    # Tight check against the same mixed-precision math the kernel performs.
    assert jnp.allclose(out, ref_m, atol=3e-3, rtol=3e-3), float(
        jnp.max(jnp.abs(out - ref_m)))
    # Loose sanity check against full-f32 (bf16 matmuls are intentional).
    assert jnp.allclose(out, ref_f, atol=1e-1, rtol=1e-1), float(
        jnp.max(jnp.abs(out - ref_f)))

    # --- exercise the N-tiled, two-pass-BatchNorm path (large-batch design) ---
    N2 = 200  # not a multiple of the tile to also test row masking / padding
    x2 = jax.random.normal(kx2, (N2, C_IN), dtype=jnp.float32)
    out2 = jax.block_until_ready(
        embedding_layer(x2, w1, g1, b1, w2, g2, b2,
                        block_rows=64, mono_max_rows=0))
    assert out2.shape == (N2, H2), out2.shape
    ref2 = reference_mixed(x2, w1, g1, b1, w2, g2, b2)
    assert jnp.allclose(out2, ref2, atol=3e-3, rtol=3e-3), float(
        jnp.max(jnp.abs(out2 - ref2)))

    print("KERNEL_OK")
</pallas_src>

<mosaic_0001>
module attributes {stable_mosaic.version = 11 : i64} {
  func.func @_mono_kernel(%arg0: i32, %arg1: memref<8x512xbf16, #tpu.memory_space<vmem>>, %arg2: memref<512x256xbf16, #tpu.memory_space<vmem>>, %arg3: memref<2x256xf32, #tpu.memory_space<vmem>>, %arg4: memref<256x128xbf16, #tpu.memory_space<vmem>>, %arg5: memref<2x128xf32, #tpu.memory_space<vmem>>, %arg6: memref<8x128xf32, #tpu.memory_space<vmem>>) attributes {dimension_semantics = [#tpu.dimension_semantics<arbitrary>], iteration_bounds = array<i64: 1>, scalar_prefetch = 0 : i64, scratch_operands = 0 : i64, tpu.core_type = #tpu.core_type<tc>, window_params = [{pipeline_mode = #tpu.pipeline_mode<synchronous>, transform_indices = @transform_0, window_bounds = array<i64: 8, 512>}, {pipeline_mode = #tpu.pipeline_mode<synchronous>, transform_indices = @transform_1, window_bounds = array<i64: 512, 256>}, {pipeline_mode = #tpu.pipeline_mode<synchronous>, transform_indices = @transform_2, window_bounds = array<i64: 2, 256>}, {pipeline_mode = #tpu.pipeline_mode<synchronous>, transform_indices = @transform_3, window_bounds = array<i64: 256, 128>}, {pipeline_mode = #tpu.pipeline_mode<synchronous>, transform_indices = @transform_4, window_bounds = array<i64: 2, 128>}, {pipeline_mode = #tpu.pipeline_mode<synchronous>, transform_indices = @transform_5, window_bounds = array<i64: 8, 128>}]} {
    %c0 = arith.constant 0 : index
    %c0_0 = arith.constant 0 : index
    %0 = vector.load %arg1[%c0, %c0_0] : memref<8x512xbf16, #tpu.memory_space<vmem>>, vector<8x512xbf16>
    %c0_1 = arith.constant 0 : index
    %c0_2 = arith.constant 0 : index
    %1 = vector.load %arg2[%c0_1, %c0_2] : memref<512x256xbf16, #tpu.memory_space<vmem>>, vector<512x256xbf16>
    %cst = arith.constant dense<0.000000e+00> : vector<8x256xf32>
    %2 = tpu.matmul %0, %1, %cst {dimension_numbers = #tpu.dot_dimension_numbers<[1], [0], [0], [1], [0, 0, 1, 1], [], []>} : vector<8x512xbf16>, vector<512x256xbf16>, vector<8x256xf32> -> vector<8x256xf32>
    %c0_3 = arith.constant 0 : index
    %c0_4 = arith.constant 0 : index
    %3 = vector.load %arg3[%c0_3, %c0_4] : memref<2x256xf32, #tpu.memory_space<vmem>>, vector<2x256xf32>
    %cst_5 = arith.constant dense<0.000000e+00> : vector<256xf32>
    %4 = vector.multi_reduction <add>, %2, %cst_5 [0] : vector<8x256xf32> to vector<256xf32>
    %5 = vector.shape_cast %4 : vector<256xf32> to vector<1x256xf32>
    %cst_6 = arith.constant 8.000000e+00 : f32
    %6 = vector.broadcast %cst_6 : f32 to vector<1x256xf32>
    %7 = arith.divf %5, %6 : vector<1x256xf32>
    %8 = vector.broadcast %7 : vector<1x256xf32> to vector<8x256xf32>
    %9 = arith.subf %2, %8 : vector<8x256xf32>
    %10 = arith.mulf %9, %9 : vector<8x256xf32>
    %cst_7 = arith.constant dense<0.000000e+00> : vector<256xf32>
    %11 = vector.multi_reduction <add>, %10, %cst_7 [0] : vector<8x256xf32> to vector<256xf32>
    %12 = vector.shape_cast %11 : vector<256xf32> to vector<1x256xf32>
    %cst_8 = arith.constant 8.000000e+00 : f32
    %13 = vector.broadcast %cst_8 : f32 to vector<1x256xf32>
    %14 = arith.divf %12, %13 : vector<1x256xf32>
    %15 = vector.extract_strided_slice %3 {offsets = [0, 0], sizes = [1, 256], strides = [1, 1]} : vector<2x256xf32> to vector<1x256xf32>
    %cst_9 = arith.constant 9.99999974E-6 : f32
    %16 = vector.broadcast %cst_9 : f32 to vector<1x256xf32>
    %17 = arith.addf %14, %16 : vector<1x256xf32>
    %18 = math.rsqrt %17 : vector<1x256xf32>
    %19 = arith.mulf %15, %18 : vector<1x256xf32>
    %20 = vector.extract_strided_slice %3 {offsets = [1, 0], sizes = [1, 256], strides = [1, 1]} : vector<2x256xf32> to vector<1x256xf32>
    %21 = arith.mulf %7, %19 : vector<1x256xf32>
    %22 = arith.subf %20, %21 : vector<1x256xf32>
    %23 = vector.broadcast %19 : vector<1x256xf32> to vector<8x256xf32>
    %24 = arith.mulf %2, %23 : vector<8x256xf32>
    %25 = vector.broadcast %22 : vector<1x256xf32> to vector<8x256xf32>
    %26 = arith.addf %24, %25 : vector<8x256xf32>
    %cst_10 = arith.constant 0.000000e+00 : f32
    %27 = vector.broadcast %cst_10 : f32 to vector<8x256xf32>
    %28 = arith.maximumf %26, %27 : vector<8x256xf32>
    %29 = arith.truncf %28 : vector<8x256xf32> to vector<8x256xbf16>
    %c0_11 = arith.constant 0 : index
    %c0_12 = arith.constant 0 : index
    %30 = vector.load %arg4[%c0_11, %c0_12] : memref<256x128xbf16, #tpu.memory_space<vmem>>, vector<256x128xbf16>
    %cst_13 = arith.constant dense<0.000000e+00> : vector<8x128xf32>
    %31 = tpu.matmul %29, %30, %cst_13 {dimension_numbers = #tpu.dot_dimension_numbers<[1], [0], [0], [1], [0, 0, 1, 1], [], []>} : vector<8x256xbf16>, vector<256x128xbf16>, vector<8x128xf32> -> vector<8x128xf32>
    %c0_14 = arith.constant 0 : index
    %c0_15 = arith.constant 0 : index
    %32 = vector.load %arg5[%c0_14, %c0_15] : memref<2x128xf32, #tpu.memory_space<vmem>>, vector<2x128xf32>
    %cst_16 = arith.constant dense<0.000000e+00> : vector<128xf32>
    %33 = vector.multi_reduction <add>, %31, %cst_16 [0] : vector<8x128xf32> to vector<128xf32>
    %34 = vector.shape_cast %33 : vector<128xf32> to vector<1x128xf32>
    %cst_17 = arith.constant 8.000000e+00 : f32
    %35 = vector.broadcast %cst_17 : f32 to vector<1x128xf32>
    %36 = arith.divf %34, %35 : vector<1x128xf32>
    %37 = vector.broadcast %36 : vector<1x128xf32> to vector<8x128xf32>
    %38 = arith.subf %31, %37 : vector<8x128xf32>
    %39 = arith.mulf %38, %38 : vector<8x128xf32>
    %cst_18 = arith.constant dense<0.000000e+00> : vector<128xf32>
    %40 = vector.multi_reduction <add>, %39, %cst_18 [0] : vector<8x128xf32> to vector<128xf32>
    %41 = vector.shape_cast %40 : vector<128xf32> to vector<1x128xf32>
    %cst_19 = arith.constant 8.000000e+00 : f32
    %42 = vector.broadcast %cst_19 : f32 to vector<1x128xf32>
    %43 = arith.divf %41, %42 : vector<1x128xf32>
    %44 = vector.extract_strided_slice %32 {offsets = [0, 0], sizes = [1, 128], strides = [1, 1]} : vector<2x128xf32> to vector<1x128xf32>
    %cst_20 = arith.constant 9.99999974E-6 : f32
    %45 = vector.broadcast %cst_20 : f32 to vector<1x128xf32>
    %46 = arith.addf %43, %45 : vector<1x128xf32>
    %47 = math.rsqrt %46 : vector<1x128xf32>
    %48 = arith.mulf %44, %47 : vector<1x128xf32>
    %49 = vector.extract_strided_slice %32 {offsets = [1, 0], sizes = [1, 128], strides = [1, 1]} : vector<2x128xf32> to vector<1x128xf32>
    %50 = arith.mulf %36, %48 : vector<1x128xf32>
    %51 = arith.subf %49, %50 : vector<1x128xf32>
    %52 = vector.broadcast %48 : vector<1x128xf32> to vector<8x128xf32>
    %53 = arith.mulf %31, %52 : vector<8x128xf32>
    %54 = vector.broadcast %51 : vector<1x128xf32> to vector<8x128xf32>
    %55 = arith.addf %53, %54 : vector<8x128xf32>
    %cst_21 = arith.constant 0.000000e+00 : f32
    %56 = vector.broadcast %cst_21 : f32 to vector<8x128xf32>
    %57 = arith.maximumf %55, %56 : vector<8x128xf32>
    %c0_22 = arith.constant 0 : index
    %c0_23 = arith.constant 0 : index
    %58 = vector.load %arg6[%c0_22, %c0_23] : memref<8x128xf32, #tpu.memory_space<vmem>>, vector<8x128xf32>
    tpu.vector_store %arg6[%c0_22, %c0_23], %57 {strides = array<i32>} : memref<8x128xf32, #tpu.memory_space<vmem>>, vector<8x128xf32>,
    return
  }
  func.func @transform_0(%arg0: i32) -> (i32, i32) {
    %c0_i32 = arith.constant 0 : i32
    %c0_i32_0 = arith.constant 0 : i32
    %c0_i32_1 = arith.constant 0 : i32
    return %c0_i32, %c0_i32_0 : i32, i32
  }
  func.func @transform_1(%arg0: i32) -> (i32, i32) {
    %c0_i32 = arith.constant 0 : i32
    %c0_i32_0 = arith.constant 0 : i32
    %c0_i32_1 = arith.constant 0 : i32
    return %c0_i32, %c0_i32_0 : i32, i32
  }
  func.func @transform_2(%arg0: i32) -> (i32, i32) {
    %c0_i32 = arith.constant 0 : i32
    %c0_i32_0 = arith.constant 0 : i32
    %c0_i32_1 = arith.constant 0 : i32
    return %c0_i32, %c0_i32_0 : i32, i32
  }
  func.func @transform_3(%arg0: i32) -> (i32, i32) {
    %c0_i32 = arith.constant 0 : i32
    %c0_i32_0 = arith.constant 0 : i32
    %c0_i32_1 = arith.constant 0 : i32
    return %c0_i32, %c0_i32_0 : i32, i32
  }
  func.func @transform_4(%arg0: i32) -> (i32, i32) {
    %c0_i32 = arith.constant 0 : i32
    %c0_i32_0 = arith.constant 0 : i32
    %c0_i32_1 = arith.constant 0 : i32
    return %c0_i32, %c0_i32_0 : i32, i32
  }
  func.func @transform_5(%arg0: i32) -> (i32, i32) {
    %c0_i32 = arith.constant 0 : i32
    %c0_i32_0 = arith.constant 0 : i32
    %c0_i32_1 = arith.constant 0 : i32
    return %c0_i32, %c0_i32_0 : i32, i32
  }
}

</mosaic_0001>

<bundles_post_ra>
// kernel: tpu_custom_call.1
= control target key start
LH: loop header
LB: loop body
LE: loop exit
PB: predicated region body
PF: predicated region fallthrough
CT: control target
= control target key end

     0   :  { %10 = vsyncpa [#allocation3], 0  ;;  %s1307_s0 = inlined_call_operand.hbm [shape: bf16[8,512], index: 0, kind: input, shape index: {}]   ;;  %s1308_s1 = inlined_call_operand.hbm [shape: bf16[512,256], index: 1, kind: input, shape index: {}]   ;;  %s1309_s2 = inlined_call_operand.vmem [shape: f32[2,256], index: 2, kind: input, shape index: {}]   ;;  %s1310_s3 = inlined_call_operand.hbm [shape: bf16[256,128], index: 3, kind: input, shape index: {}]   ;;  %s1311_s4 = inlined_call_operand.vmem [shape: f32[2,128], index: 4, kind: input, shape index: {}]   ;;  %s1312_s5 = inlined_call_operand.hbm [shape: f32[8,128], index: 5, kind: output, shape index: {}]  }
   0x1   :  { %11 = vsyncpa [#allocation6], 0 }
   0x2   :  { %12 = vsyncpa [#allocation4], 0  ;;  %s1208_s18 = smov [#allocation5]   ;;  %s1114_s22 = scalar_lea.hbm %s1308_s1, 8192 }
   0x3   :  { %s28_s19 = sshll.u32 %s1208_s18, 4  ;;  %p1115_p0 = scmp.ne.s32.totalorder %s1308_s1, %s1114_s22  ;;  %s29_s19 = int_to_ptr.vmem [resolvable:$true] %s28_s19 }
   0x4   :  { %p1118_p1 = scmp.lt.u32.totalorder %s1114_s22, %s1308_s1 }
   0x6   :  { %p1120_p2 = pnand %p1118_p1, %p1115_p0 }
   0x8   :  { %1123 = shalt.err (!%p1120_p2)
}
   0x9   :  { %s1124_s27 = scalar_lea.vmem %s29_s19, 8192  ;;  %p1129_p4 = scmp.lt.s32.totalorder %s29_s19, %s29_s19 }
   0xa   :  { %p1125_p3 = scmp.ne.s32.totalorder %s29_s19, %s1124_s27  ;;  %p1130_p5 = scmp.lt.s32.totalorder %s1124_s27, %s1124_s27 }
   0xc   :  { %p1131_p6 = por %p1130_p5, %p1129_p4 }
   0xe   :  { %p1132_p7 = pnand %p1131_p6, %p1125_p3 }
  0x10   :  { %1135 = shalt.err (!%p1132_p7)
}
  0x11   :  { %s1209_s28 = smov 128   ;;  %s1210_s29 = smov 8  }
  0x12   :  { %34 = dma.hbm_to_vmem [thread:$0]  %s1308_s1, 8192, %s29_s19, [#allocation6], %s1209_s28, %s1209_s28, %s1210_s29  }
  0x13   :  { %s1211_s7 = smov [#allocation2]   ;;  %s1212_s9 = smov [#allocation7]  }
  0x14   :  { %s19_s8 = sshll.u32 %s1211_s7, 4  ;;  %s42_s10 = sshll.u32 %s1212_s9, 4  ;;  %s20_s8 = int_to_ptr.vmem [resolvable:$true] %s19_s8  ;;  %s43_s10 = int_to_ptr.vmem [resolvable:$true] %s42_s10 }
  0x15   :  { %s1136_s13 = scalar_lea.hbm %s1307_s0, 256 }
  0x16   :  { %p1137_p8 = scmp.ne.s32.totalorder %s1307_s0, %s1136_s13  ;;  %p1140_p9 = scmp.lt.u32.totalorder %s1136_s13, %s1307_s0 }
  0x18   :  { %p1142_p10 = pnand %p1140_p9, %p1137_p8 }
  0x1a   :  { %1145 = shalt.err (!%p1142_p10)
}
  0x1b   :  { %s1146_s1 = scalar_lea.vmem %s20_s8, 256  ;;  %p1151_p12 = scmp.lt.s32.totalorder %s20_s8, %s20_s8 }
  0x1c   :  { %p1147_p11 = scmp.ne.s32.totalorder %s20_s8, %s1146_s1  ;;  %p1152_p13 = scmp.lt.s32.totalorder %s1146_s1, %s1146_s1 }
  0x1e   :  { %p1153_p0 = por %p1152_p13, %p1151_p12 }
  0x20   :  { %p1154_p1 = pnand %p1153_p0, %p1147_p11 }
  0x22   :  { %1157 = shalt.err (!%p1154_p1)
}
  0x23   :  { %22 = dma.hbm_to_vmem [thread:$0]  %s1307_s0, 256, %s20_s8, [#allocation3]  }
  0x24   :  { %s1158_s22 = scalar_lea.hbm %s1310_s3, 2048 }
  0x25   :  { %p1159_p2 = scmp.ne.s32.totalorder %s1310_s3, %s1158_s22  ;;  %p1162_p3 = scmp.lt.u32.totalorder %s1158_s22, %s1310_s3 }
  0x27   :  { %p1164_p4 = pnand %p1162_p3, %p1159_p2 }
  0x29   :  { %1167 = shalt.err (!%p1164_p4)
}
  0x2a   :  { %s1168_s27 = scalar_lea.vmem %s43_s10, 2048  ;;  %p1173_p6 = scmp.lt.s32.totalorder %s43_s10, %s43_s10 }
  0x2b   :  { %p1169_p5 = scmp.ne.s32.totalorder %s43_s10, %s1168_s27  ;;  %p1174_p7 = scmp.lt.s32.totalorder %s1168_s27, %s1168_s27 }
  0x2d   :  { %p1175_p8 = por %p1174_p7, %p1173_p6 }
  0x2f   :  { %p1176_p9 = pnand %p1175_p8, %p1169_p5 }
  0x31   :  { %1179 = shalt.err (!%p1176_p9)
}
  0x32   :  { %s1213_s0 = smov 64   ;;  %s1214_s28 = smov 4  }
  0x33   :  { %48 = dma.hbm_to_vmem [thread:$0]  %s1310_s3, 2048, %s43_s10, [#allocation6], %s1213_s0, %s1213_s0, %s1214_s28  }
  0x34   :  { %1202 = dma.done.wait [#allocation3], 256  }
  0x35   :  { %1203 = vsyncadd [#allocation3], 4294967040 }
  0x36   :  { %1204 = dma.done.wait [#allocation6], 10240  }
  0x37   :  { %1205 = vsyncadd [#allocation6], 4294957056  ;;  %v992_v0 = vld [vmem:[#allocation5 + $0x4] ss:$8 sps:$4 sm:$0xff]   ;;  %v996_v2 = vld [vmem:[#allocation5] ss:$8 sps:$4 sm:$0xff]  }
  0x38   :  { %v994_v1 = vld [vmem:[#allocation5 + $0x104] ss:$8 sps:$4 sm:$0xff]   ;;  %461 = vmatprep.subr.bf16.mxu1 %v992_v0  ;;  %v997_v3 = vld [vmem:[#allocation5 + $0x100] ss:$8 sps:$4 sm:$0xff]   ;;  %v998_v4 = vld [vmem:[#allocation5 + $0x14] ss:$8 sps:$4 sm:$0xff]  }
  0x39   :  { %502 = vmatprep.subr.bf16.mxu0 %v994_v1  ;;  %462 = vmatpush1.bf16.msra.mxu1 %v996_v2  ;;  %v1000_v5 = vld [vmem:[#allocation5 + $0x114] ss:$8 sps:$4 sm:$0xff]   ;;  %v1002_v6 = vld [vmem:[#allocation5 + $0x10] ss:$8 sps:$4 sm:$0xff]   ;;  %v1004_v8 = vld [vmem:[#allocation5 + $0x24] ss:$8 sps:$4 sm:$0xff]  }
  0x3a   :  { %503 = vmatpush1.bf16.msra.mxu0 %v997_v3  ;;  %463 = vmatprep.subr.bf16.mxu1 %v998_v4  ;;  %v1003_v7 = vld [vmem:[#allocation5 + $0x110] ss:$8 sps:$4 sm:$0xff]   ;;  %v1006_v9 = vld [vmem:[#allocation5 + $0x124] ss:$8 sps:$4 sm:$0xff]   ;;  %v1008_v10 = vld [vmem:[#allocation5 + $0x20] ss:$8 sps:$4 sm:$0xff]  }
  0x3b   :  { %504 = vmatprep.subr.bf16.mxu0 %v1000_v5  ;;  %v1009_v11 = vld [vmem:[#allocation5 + $0x120] ss:$8 sps:$4 sm:$0xff]   ;;  %v1010_v12 = vld [vmem:[#allocation5 + $0x34] ss:$8 sps:$4 sm:$0xff]   ;;  %v1014_v14 = vld [vmem:[#allocation5 + $0x30] ss:$8 sps:$4 sm:$0xff]  }
  0x3c   :  { %v1012_v13 = vld [vmem:[#allocation5 + $0x134] ss:$8 sps:$4 sm:$0xff]   ;;  %v1015_v15 = vld [vmem:[#allocation5 + $0x130] ss:$8 sps:$4 sm:$0xff]   ;;  %v1016_v16 = vld [vmem:[#allocation5 + $0x44] ss:$8 sps:$4 sm:$0xff]  }
  0x3d   :  { %464 = vmatpush1.bf16.msra.mxu1 %v1002_v6  ;;  %v1018_v17 = vld [vmem:[#allocation5 + $0x144] ss:$8 sps:$4 sm:$0xff]   ;;  %v1020_v18 = vld [vmem:[#allocation5 + $0x40] ss:$8 sps:$4 sm:$0xff]   ;;  %v1022_v20 = vld [vmem:[#allocation5 + $0x54] ss:$8 sps:$4 sm:$0xff]  }
  0x3e   :  { %505 = vmatpush1.bf16.msra.mxu0 %v1003_v7  ;;  %465 = vmatprep.subr.bf16.mxu1 %v1004_v8  ;;  %v1021_v19 = vld [vmem:[#allocation5 + $0x140] ss:$8 sps:$4 sm:$0xff]   ;;  %v1024_v21 = vld [vmem:[#allocation5 + $0x154] ss:$8 sps:$4 sm:$0xff]   ;;  %v1026_v22 = vld [vmem:[#allocation5 + $0x50] ss:$8 sps:$4 sm:$0xff]  }
  0x3f   :  { %506 = vmatprep.subr.bf16.mxu0 %v1006_v9  ;;  %v1027_v23 = vld [vmem:[#allocation5 + $0x150] ss:$8 sps:$4 sm:$0xff]   ;;  %v1028_v24 = vld [vmem:[#allocation5 + $0x64] ss:$8 sps:$4 sm:$0xff]   ;;  %v1032_v26 = vld [vmem:[#allocation5 + $0x60] ss:$8 sps:$4 sm:$0xff]  }
  0x40   :  { %v1030_v25 = vld [vmem:[#allocation5 + $0x164] ss:$8 sps:$4 sm:$0xff]   ;;  %v1033_v27 = vld [vmem:[#allocation5 + $0x160] ss:$8 sps:$4 sm:$0xff]   ;;  %v1034_v28 = vld [vmem:[#allocation5 + $0x74] ss:$8 sps:$4 sm:$0xff]  }
  0x41   :  { %466 = vmatpush1.bf16.msra.mxu1 %v1008_v10  ;;  %v1036_v29 = vld [vmem:[#allocation5 + $0x174] ss:$8 sps:$4 sm:$0xff]   ;;  %v1038_v30 = vld [vmem:[#allocation5 + $0x70] ss:$8 sps:$4 sm:$0xff]   ;;  %v1040_v32 = vld [vmem:[#allocation5 + $0x84] ss:$8 sps:$4 sm:$0xff]  }
  0x42   :  { %507 = vmatpush1.bf16.msra.mxu0 %v1009_v11  ;;  %467 = vmatprep.subr.bf16.mxu1 %v1010_v12  ;;  %v1039_v31 = vld [vmem:[#allocation5 + $0x170] ss:$8 sps:$4 sm:$0xff]   ;;  %v1042_v33 = vld [vmem:[#allocation5 + $0x184] ss:$8 sps:$4 sm:$0xff]   ;;  %v1044_v34 = vld [vmem:[#allocation5 + $0x80] ss:$8 sps:$4 sm:$0xff]  }
  0x43   :  { %508 = vmatprep.subr.bf16.mxu0 %v1012_v13  ;;  %v1045_v35 = vld [vmem:[#allocation5 + $0x180] ss:$8 sps:$4 sm:$0xff]   ;;  %v1046_v36 = vld [vmem:[#allocation5 + $0x94] ss:$8 sps:$4 sm:$0xff]   ;;  %v1050_v38 = vld [vmem:[#allocation5 + $0x90] ss:$8 sps:$4 sm:$0xff]  }
  0x44   :  { %v1048_v37 = vld [vmem:[#allocation5 + $0x194] ss:$8 sps:$4 sm:$0xff]   ;;  %v1051_v39 = vld [vmem:[#allocation5 + $0x190] ss:$8 sps:$4 sm:$0xff]   ;;  %v1052_v40 = vld [vmem:[#allocation5 + $0xa4] ss:$8 sps:$4 sm:$0xff]  }
  0x45   :  { %468 = vmatpush1.bf16.msra.mxu1 %v1014_v14  ;;  %v1054_v41 = vld [vmem:[#allocation5 + $0x1a4] ss:$8 sps:$4 sm:$0xff]   ;;  %v1056_v42 = vld [vmem:[#allocation5 + $0xa0] ss:$8 sps:$4 sm:$0xff]   ;;  %v1058_v44 = vld [vmem:[#allocation5 + $0xb4] ss:$8 sps:$4 sm:$0xff]  }
  0x46   :  { %509 = vmatpush1.bf16.msra.mxu0 %v1015_v15  ;;  %469 = vmatprep.subr.bf16.mxu1 %v1016_v16  ;;  %v1057_v43 = vld [vmem:[#allocation5 + $0x1a0] ss:$8 sps:$4 sm:$0xff]   ;;  %v1060_v45 = vld [vmem:[#allocation5 + $0x1b4] ss:$8 sps:$4 sm:$0xff]   ;;  %v1062_v46 = vld [vmem:[#allocation5 + $0xb0] ss:$8 sps:$4 sm:$0xff]  }
  0x47   :  { %510 = vmatprep.subr.bf16.mxu0 %v1018_v17  ;;  %v1063_v47 = vld [vmem:[#allocation5 + $0x1b0] ss:$8 sps:$4 sm:$0xff]   ;;  %v1064_v49 = vld [vmem:[#allocation5 + $0xc4] ss:$8 sps:$4 sm:$0xff]   ;;  %v1068_v54 = vld [vmem:[#allocation5 + $0xc0] ss:$8 sps:$4 sm:$0xff]  }
  0x48   :  { %v61_v48 = vld [vmem:[#allocation2] sm:$0xff]  ;;  %v1066_v50 = vld [vmem:[#allocation5 + $0x1c4] ss:$8 sps:$4 sm:$0xff]   ;;  %v62_v52 = vld [vmem:[#allocation2 + $0x8] sm:$0xff]  ;;  %s1216_s8 = smov [#allocation8]  }
  0x49   :  { %470 = vmatpush1.bf16.msra.mxu1 %v1020_v18  ;;  %v876_v51 = vcombine.high %v61_v48, %v61_v48  ;;  %v878_v53 = vcombine.high %v62_v52, %v62_v52  ;;  %v1069_v55 = vld [vmem:[#allocation5 + $0x1c0] ss:$8 sps:$4 sm:$0xff]   ;;  %v1070_v56 = vld [vmem:[#allocation5 + $0xd4] ss:$8 sps:$4 sm:$0xff]   ;;  %v1074_v58 = vld [vmem:[#allocation5 + $0xd0] ss:$8 sps:$4 sm:$0xff]   ;;  %v875_v4 = vcombine.low %v61_v48, %v61_v48  ;;  %v877_v5 = vcombine.low %v62_v52, %v62_v52 }
  0x4a   :  { %511 = vmatpush1.bf16.msra.mxu0 %v1021_v19  ;;  %471 = vmatprep.subr.bf16.mxu1 %v1022_v20  ;;  %v1072_v57 = vld [vmem:[#allocation5 + $0x1d4] ss:$8 sps:$4 sm:$0xff]   ;;  %v1075_v59 = vld [vmem:[#allocation5 + $0x1d0] ss:$8 sps:$4 sm:$0xff]   ;;  %v1076_v60 = vld [vmem:[#allocation5 + $0xe4] ss:$8 sps:$4 sm:$0xff]  }
  0x4b   :  { %512 = vmatprep.subr.bf16.mxu0 %v1024_v21  ;;  %493 = vmatprep.mubr.bf16.mxu1 %v876_v51  ;;  %v1078_v61 = vld [vmem:[#allocation5 + $0x1e4] ss:$8 sps:$4 sm:$0xff]   ;;  %v1080_v62 = vld [vmem:[#allocation5 + $0xe0] ss:$8 sps:$4 sm:$0xff]   ;;  %v1082_v0 = vld [vmem:[#allocation5 + $0xf4] ss:$8 sps:$4 sm:$0xff]  }
  0x4c   :  { %534 = vmatprep.mubr.bf16.mxu0 %v878_v53  ;;  %v1081_v63 = vld [vmem:[#allocation5 + $0x1e0] ss:$8 sps:$4 sm:$0xff]   ;;  %v1084_v1 = vld [vmem:[#allocation5 + $0x1f4] ss:$8 sps:$4 sm:$0xff]   ;;  %v1086_v2 = vld [vmem:[#allocation5 + $0xf0] ss:$8 sps:$4 sm:$0xff]  }
  0x4d   :  { %472 = vmatpush1.bf16.msra.mxu1 %v1026_v22  ;;  %v1087_v3 = vld [vmem:[#allocation5 + $0x1f0] ss:$8 sps:$4 sm:$0xff]   ;;  %v1092_v6 = vld [vmem:[#allocation7 + $0x40] sm:$0xff]   ;;  %v1094_v8 = vld [vmem:[#allocation7 + $0x48] sm:$0xff]   ;;  %s865_s9 = sshll.u32 %s1216_s8, 4  ;;  %s866_s9 = int_to_ptr.vmem [resolvable:$true] %s865_s9 }
  0x4e   :  { %513 = vmatpush1.bf16.msra.mxu0 %v1027_v23  ;;  %473 = vmatprep.subr.bf16.mxu1 %v1028_v24  ;;  %v1093_v7 = vld [vmem:[#allocation7] sm:$0xff]   ;;  %v1095_v9 = vld [vmem:[#allocation7 + $0x8] sm:$0xff]   ;;  %v1096_v10 = vld [vmem:[#allocation7 + $0x50] sm:$0xff]   ;;  %s1180_s10 = scalar_lea.vmem %s866_s9, 128  ;;  %p1185_p11 = scmp.lt.s32.totalorder %s866_s9, %s866_s9 }
  0x4f   :  { %514 = vmatprep.subr.bf16.mxu0 %v1030_v25  ;;  %v1097_v11 = vld [vmem:[#allocation7 + $0x10] sm:$0xff]   ;;  %v1098_v12 = vld [vmem:[#allocation7 + $0x58] sm:$0xff]   ;;  %v1100_v14 = vld [vmem:[#allocation7 + $0x60] sm:$0xff]   ;;  %p1181_p10 = scmp.ne.s32.totalorder %s866_s9, %s1180_s10  ;;  %p1186_p12 = scmp.lt.s32.totalorder %s1180_s10, %s1180_s10 }
  0x50   :  { %v1099_v13 = vld [vmem:[#allocation7 + $0x18] sm:$0xff]   ;;  %v1101_v15 = vld [vmem:[#allocation7 + $0x20] sm:$0xff]   ;;  %v1102_v16 = vld [vmem:[#allocation7 + $0x68] sm:$0xff]  }
  0x51   :  { %474 = vmatpush1.bf16.msra.mxu1 %v1032_v26  ;;  %v1103_v17 = vld [vmem:[#allocation7 + $0x28] sm:$0xff]   ;;  %v1104_v18 = vld [vmem:[#allocation7 + $0x70] sm:$0xff]   ;;  %v1106_v20 = vld [vmem:[#allocation7 + $0x78] sm:$0xff]   ;;  %p1187_p13 = por %p1186_p12, %p1185_p11 }
  0x52   :  { %515 = vmatpush1.bf16.msra.mxu0 %v1033_v27  ;;  %475 = vmatprep.subr.bf16.mxu1 %v1034_v28  ;;  %v1105_v19 = vld [vmem:[#allocation7 + $0x30] sm:$0xff]   ;;  %v1107_v21 = vld [vmem:[#allocation7 + $0x38] sm:$0xff]  }
  0x53   :  { %516 = vmatprep.subr.bf16.mxu0 %v1036_v29  ;;  %p1188_p0 = pnand %p1187_p13, %p1181_p10 }
  0x55   :  { %476 = vmatpush1.bf16.msra.mxu1 %v1038_v30 }
  0x56   :  { %517 = vmatpush1.bf16.msra.mxu0 %v1039_v31  ;;  %477 = vmatprep.subr.bf16.mxu1 %v1040_v32 }
  0x57   :  { %518 = vmatprep.subr.bf16.mxu0 %v1042_v33 }
  0x59   :  { %478 = vmatpush1.bf16.msra.mxu1 %v1044_v34 }
  0x5a   :  { %519 = vmatpush1.bf16.msra.mxu0 %v1045_v35  ;;  %479 = vmatprep.subr.bf16.mxu1 %v1046_v36 }
  0x5b   :  { %520 = vmatprep.subr.bf16.mxu0 %v1048_v37 }
  0x5d   :  { %480 = vmatpush1.bf16.msra.mxu1 %v1050_v38 }
  0x5e   :  { %521 = vmatpush1.bf16.msra.mxu0 %v1051_v39  ;;  %481 = vmatprep.subr.bf16.mxu1 %v1052_v40 }
  0x5f   :  { %522 = vmatprep.subr.bf16.mxu0 %v1054_v41 }
  0x61   :  { %482 = vmatpush1.bf16.msra.mxu1 %v1056_v42 }
  0x62   :  { %523 = vmatpush1.bf16.msra.mxu0 %v1057_v43  ;;  %483 = vmatprep.subr.bf16.mxu1 %v1058_v44 }
  0x63   :  { %524 = vmatprep.subr.bf16.mxu0 %v1060_v45 }
  0x65   :  { %484 = vmatpush1.bf16.msra.mxu1 %v1062_v46 }
  0x66   :  { %525 = vmatpush1.bf16.msra.mxu0 %v1063_v47  ;;  %485 = vmatprep.subr.bf16.mxu1 %v1064_v49 }
  0x67   :  { %526 = vmatprep.subr.bf16.mxu0 %v1066_v50 }
  0x69   :  { %486 = vmatpush1.bf16.msra.mxu1 %v1068_v54 }
  0x6a   :  { %527 = vmatpush1.bf16.msra.mxu0 %v1069_v55  ;;  %487 = vmatprep.subr.bf16.mxu1 %v1070_v56 }
  0x6b   :  { %528 = vmatprep.subr.bf16.mxu0 %v1072_v57 }
  0x6d   :  { %488 = vmatpush1.bf16.msra.mxu1 %v1074_v58 }
  0x6e   :  { %529 = vmatpush1.bf16.msra.mxu0 %v1075_v59  ;;  %489 = vmatprep.subr.bf16.mxu1 %v1076_v60 }
  0x6f   :  { %530 = vmatprep.subr.bf16.mxu0 %v1078_v61 }
  0x71   :  { %490 = vmatpush1.bf16.msra.mxu1 %v1080_v62 }
  0x72   :  { %531 = vmatpush1.bf16.msra.mxu0 %v1081_v63  ;;  %491 = vmatprep.subr.bf16.mxu1 %v1082_v0 }
  0x73   :  { %532 = vmatprep.subr.bf16.mxu0 %v1084_v1 }
  0x75   :  { %492 = vmatpush1.bf16.msra.mxu1 %v1086_v2  ;;  %v1215_v2 = vmov 1983009808  }
  0x76   :  { %533 = vmatpush1.bf16.msra.mxu0 %v1087_v3  ;;  %959 = vmatprep.subr.bf16.mxu1 %v1092_v6  ;;  %v585_v3 = vunpack.c.l.s4 %v1215_v2 }
  0x78   :  { %494 = vmatmul.mubr.bf16.vlgmr.msra.gmra.mrb[0].mxu1 %v875_v4  ;;  %v587_v4 = vlaneseq }
  0x79   :  { %535 = vmatmul.mubr.bf16.vlgmr.msra.gmra.mrb[0].mxu0 %v877_v5  ;;  %960 = vmatpush3.bf16.msra.mxu1 %v1093_v7  ;;  %v586_v5 = vunpack.c.0.s8 %v585_v3 }
  0x7a   :  { %961 = vmatprep.subr.bf16.mxu1 %v1094_v8  ;;  %v588_v6 = vshrl.u32 %v587_v4, 7 }
  0x7c   :  { %v589_v8 = vsub.s32 %v586_v5, %v588_v6 }
  0x7d   :  { %962 = vmatpush3.bf16.msra.mxu1 %v1095_v9 }
  0x7e   :  { %963 = vmatprep.subr.bf16.mxu1 %v1096_v10 }
  0x81   :  { %964 = vmatpush3.bf16.msra.mxu1 %v1097_v11  ;;  %v543_v11 = vld [vmem:[%s1309_s2] sm:$0xf] }
  0x82   :  { %965 = vmatprep.subr.bf16.mxu1 %v1098_v12 }
  0x85   :  { %966 = vmatpush3.bf16.msra.mxu1 %v1099_v13  ;;  %v596_v13 = vsub.s32 0, %v588_v6 }
  0x86   :  { %967 = vmatprep.subr.bf16.mxu1 %v1100_v14  ;;  %v600_v14 = vsub.s32 2, %v588_v6 }
  0x89   :  { %968 = vmatpush3.bf16.msra.mxu1 %v1101_v15 }
  0x8a   :  { %969 = vmatprep.subr.bf16.mxu1 %v1102_v16 }
  0x8d   :  { %970 = vmatpush3.bf16.msra.mxu1 %v1103_v17 }
  0x8e   :  { %971 = vmatprep.subr.bf16.mxu1 %v1104_v18 }
  0x91   :  { %972 = vmatpush3.bf16.msra.mxu1 %v1105_v19 }
  0x92   :  { %973 = vmatprep.subr.bf16.mxu1 %v1106_v20 }
  0x95   :  { %974 = vmatpush3.bf16.msra.mxu1 %v1107_v21 }
 0x14b   :  { %v495_v22 = vpop.f32.mrb[0].mxu1 }
 0x14c   :  { %v536_v23 = vpop.f32.mrb[0].mxu0  ;;  %v497_v25 = vpop.f32.mrb[1].mxu1 }
 0x14d   :  { %v1283_v24 = vadd.f32 %v536_v23, %v495_v22  ;;  %v538_v26 = vpop.f32.mrb[1].mxu0  ;;  %v499_v28 = vpop.f32.mrb[2].mxu1 }
 0x14e   :  { %v539_v27 = vadd.f32 %v538_v26, %v497_v25  ;;  %v540_v29 = vpop.f32.mrb[2].mxu0  ;;  %v500_v31 = vpop.f32.mrb[3].mxu1 }
 0x14f   :  { %v544_v30 = vrot.slane %v1283_v24, 4  ;;  %v541_v32 = vpop.f32.mrb[3].mxu0  ;;  %v632_v29 = vsub.s32 1, %v588_v6 }
 0x150   :  { %v550_v33 = vrot.slane %v539_v27, 4 }
 0x151   :  { %v545_v34 = vadd.f32 %v544_v30, %v1283_v24  ;;  %v636_v30 = vsub.s32 3, %v588_v6 }
 0x152   :  { %v551_v35 = vadd.f32 %v550_v33, %v539_v27 }
 0x153   :  { %v546_v36 = vrot.slane %v545_v34, 2 }
 0x154   :  { %v552_v37 = vrot.slane %v551_v35, 2 }
 0x155   :  { %v547_v38 = vadd.f32 %v546_v36, %v545_v34 }
 0x156   :  { %v553_v39 = vadd.f32 %v552_v37, %v551_v35 }
 0x157   :  { %v548_v40 = vrot.slane %v547_v38, 1 }
 0x158   :  { %v554_v41 = vrot.slane %v553_v39, 1 }
 0x159   :  { %v549_v42 = vadd.f32 %v548_v40, %v547_v38 }
 0x15a   :  { %v555_v43 = vadd.f32 %v554_v41, %v553_v39 }
 0x15b   :  { %v557_v44 = vmul.f32 0.125, %v549_v42 }
 0x15c   :  { %v558_v45 = vmul.f32 0.125, %v555_v43 }
 0x15d   :  { %v559_v46 = vsub.f32 %v1283_v24, %v557_v44 }
 0x15e   :  { %v560_v47 = vsub.f32 %v539_v27, %v558_v45 }
 0x15f   :  { %v561_v48 = vmul.f32 %v559_v46, %v559_v46 }
 0x160   :  { %v562_v49 = vmul.f32 %v560_v47, %v560_v47 }
 0x161   :  { %v563_v50 = vrot.slane %v561_v48, 4 }
 0x162   :  { %v569_v51 = vrot.slane %v562_v49, 4 }
 0x163   :  { %v564_v52 = vadd.f32 %v563_v50, %v561_v48 }
 0x164   :  { %v570_v53 = vadd.f32 %v569_v51, %v562_v49 }
 0x165   :  { %v565_v54 = vrot.slane %v564_v52, 2 }
 0x166   :  { %v571_v55 = vrot.slane %v570_v53, 2 }
 0x167   :  { %v566_v56 = vadd.f32 %v565_v54, %v564_v52 }
 0x168   :  { %v572_v57 = vadd.f32 %v571_v55, %v570_v53 }
 0x169   :  { %v567_v58 = vrot.slane %v566_v56, 1 }
 0x16a   :  { %v573_v59 = vrot.slane %v572_v57, 1 }
 0x16b   :  { %v568_v60 = vadd.f32 %v567_v58, %v566_v56 }
 0x16c   :  { %v574_v61 = vadd.f32 %v573_v59, %v572_v57 }
 0x16d   :  { %v575_v62 = vmul.f32 0.125, %v568_v60 }
 0x16e   :  { %v576_v63 = vmul.f32 0.125, %v574_v61 }
 0x16f   :  { %v577_v0 = vadd.f32 1e-05, %v575_v62  ;;  %v822_v62 = vld [vmem:[%s1311_s4] sm:$0x3] }
 0x170   :  { %v578_v1 = vadd.f32 1e-05, %v576_v63 }
 0x171   :  { %1108 = vrsqrt.f32 %v577_v0 }
 0x172   :  { %1110 = vrsqrt.f32 %v578_v1 }
 0x17b   :  { %v1109_v7 = vpop.eup %1108 }
 0x17c   :  { %v1111_v9 = vpop.eup %1110 }
 0x17d   :  { %v583_v10 = vcombine.low %v1109_v7, %v1111_v9 }
 0x17f   :  { %v590_v12 = vrot.slane %v583_v10, %v589_v8 }
 0x181   :  { %v592_v15 = vmul.f32 %v590_v12, %v543_v11 }
 0x183   :  { %v597_v16 = vrot.slane %v592_v15, %v596_v13  ;;  %v601_v17 = vrot.slane %v592_v15, %v600_v14 }
 0x185   :  { %v604_v18 = vmul.f32 %v597_v16, %v557_v44  ;;  %v605_v19 = vmul.f32 %v601_v17, %v558_v45  ;;  %v626_v20 = vrot.slane %v601_v17, %v596_v13  ;;  %v622_v21 = vrot.slane %v597_v16, %v596_v13 }
 0x187   :  { %v608_v22 = vcombine.low %v604_v18, %v605_v19  ;;  %v628_v23 = vmul.f32 %v626_v20, %v539_v27  ;;  %v627_v25 = vmul.f32 %v622_v21, %v1283_v24 }
 0x189   :  { %v615_v26 = vrot.slane %v608_v22, %v589_v8 }
 0x18b   :  { %v616_v28 = vrot.slane %v615_v26, 7 }
 0x18d   :  { %v618_v31 = vsub.f32 %v543_v11, %v616_v28 }
 0x18f   :  { %v637_v32 = vrot.slane %v618_v31, %v636_v30  ;;  %v633_v33 = vrot.slane %v618_v31, %v632_v29 }
 0x191   :  { %v647_v34 = vrot.slane %v637_v32, %v632_v29  ;;  %v643_v35 = vrot.slane %v633_v33, %v632_v29 }
 0x193   :  { %v649_v36 = vadd.f32 %v647_v34, %v628_v23  ;;  %v648_v37 = vadd.f32 %v643_v35, %v627_v25 }
 0x195   :  { %v651_v38 = vmax.f32 %v649_v36, 0.0  ;;  %v650_v39 = vmax.f32 %v648_v37, 0.0 }
 0x197   :  { %v653_v40 = vpack.c.bf16 %v651_v38, %v651_v38  ;;  %v652_v41 = vpack.c.bf16 %v650_v39, %v650_v39 }
 0x199   :  { %814 = vmatprep.mubr.bf16.mxu1 %v653_v40 }
 0x19a   :  { %815 = vmatmul.mubr.bf16.vlgmr.msra.gmra.mrb[4].mxu1 %v652_v41 }
 0x26d   :  { %v975_v27 = vpop.f32.mrb[4].mxu1 }
 0x26e   :  { %v976_v42 = vpop.f32.mrb[5].mxu1 }
 0x26f   :  { %v977_v24 = vadd.f32 %v976_v42, %v975_v27  ;;  %v978_v43 = vpop.f32.mrb[6].mxu1 }
 0x270   :  { %v979_v44 = vpop.f32.mrb[7].mxu1 }
 0x271   :  { %v823_v45 = vrot.slane %v977_v24, 4 }
 0x273   :  { %v824_v46 = vadd.f32 %v977_v24, %v823_v45 }
 0x275   :  { %v825_v47 = vrot.slane %v824_v46, 2 }
 0x277   :  { %v826_v48 = vadd.f32 %v825_v47, %v824_v46 }
 0x279   :  { %v827_v49 = vrot.slane %v826_v48, 1 }
 0x27b   :  { %v828_v50 = vadd.f32 %v827_v49, %v826_v48 }
 0x27d   :  { %v829_v51 = vmul.f32 0.125, %v828_v50 }
 0x27f   :  { %v830_v52 = vsub.f32 %v977_v24, %v829_v51 }
 0x281   :  { %v831_v53 = vmul.f32 %v830_v52, %v830_v52 }
 0x283   :  { %v832_v54 = vrot.slane %v831_v53, 4 }
 0x285   :  { %v833_v55 = vadd.f32 %v832_v54, %v831_v53 }
 0x287   :  { %v834_v56 = vrot.slane %v833_v55, 2 }
 0x289   :  { %v835_v57 = vadd.f32 %v834_v56, %v833_v55 }
 0x28b   :  { %v836_v58 = vrot.slane %v835_v57, 1 }
 0x28d   :  { %v837_v59 = vadd.f32 %v836_v58, %v835_v57 }
 0x28f   :  { %v838_v60 = vmul.f32 0.125, %v837_v59 }
 0x291   :  { %v839_v61 = vadd.f32 1e-05, %v838_v60 }
 0x293   :  { %1112 = vrsqrt.f32 %v839_v61 }
 0x29d   :  { %v1113_v63 = vpop.eup %1112 }
 0x29e   :  { %v841_v0 = vmul.f32 %v1113_v63, %v822_v62 }
 0x2a0   :  { %v842_v1 = vmul.f32 %v841_v0, %v829_v51  ;;  %v850_v3 = vrot.slane %v841_v0, %v596_v13 }
 0x2a2   :  { %v844_v2 = vrot.slane %v842_v1, 7  ;;  %v851_v5 = vmul.f32 %v977_v24, %v850_v3 }
 0x2a4   :  { %v846_v4 = vsub.f32 %v822_v62, %v844_v2 }
 0x2a6   :  { %v855_v6 = vrot.slane %v846_v4, %v632_v29 }
 0x2a8   :  { %v856_v7 = vadd.f32 %v855_v6, %v851_v5 }
 0x2aa   :  { %v857_v8 = vmax.f32 %v856_v7, 0.0 }
 0x2ac   :  { %858 = vst [vmem:[#allocation8] sm:$0xff] %v857_v8 }
 0x2ad   :  { %1191 = shalt.err (!%p1188_p0)
}
 0x2ae   :  { %s1192_s12 = scalar_lea.hbm %s1312_s5, 128 }
 0x2af   :  { %p1193_p1 = scmp.ne.s32.totalorder %s1312_s5, %s1192_s12  ;;  %p1196_p2 = scmp.lt.u32.totalorder %s1192_s12, %s1312_s5 }
 0x2b1   :  { %p1198_p3 = pnand %p1196_p2, %p1193_p1 }
 0x2b3   :  { %1201 = shalt.err (!%p1198_p3)
}
 0x2b4   :  { %868 = dma.vmem_to_hbm [thread:$0]  %s866_s9, 128, %s1312_s5, [#allocation4]  }
 0x2b5   :  { %1206 = dma.done.wait [#allocation4], 128  }
 0x2b6   :  { %1207 = vsyncadd [#allocation4], 4294967168 }
 0x2b7   :  { %872 = vsyncpa [#allocation3], 1 }
 0x2b8   :  { %873 = vsyncpa [#allocation6], 1 }
 0x2b9   :  { %874 = vsyncpa [#allocation4], 1 }

</bundles_post_ra>
